<compile_context>
chip_gen: v6e
topology: v6e:2x2x1
jax: 0.10.0
libtpu: 0.0.40
codegen_flags: <defaults>
</compile_context>

<pallas_src>
import math

import jax
import jax.numpy as jnp
from jax import lax
from jax.experimental import pallas as pl
from jax.experimental.pallas import tpu as pltpu


def _make_attn_kernel(heads_per_block: int, attn_ch: int, scale: float):
    # Fold both q-side and k-side scales (attn_ch ** -0.25 each) into q once.
    q_scale = scale * scale

    def attn_kernel(q_ref, kv_ref, o_ref):
        # q_ref  : (1, ctx_tile, Hb *     attn_ch)
        # kv_ref : (1, n_data,   Hb * 2 * attn_ch)
        # o_ref  : (1, ctx_tile, Hb *     attn_ch)
        outs = []
        for h in range(heads_per_block):  # static unroll; only small o_h stays live
            # Ref slices are free views -> load only what each matmul consumes.
            qh = q_ref[0, :, h * attn_ch:(h + 1) * attn_ch] * q_scale
            k0 = h * 2 * attn_ch
            kh = kv_ref[0, :, k0:k0 + attn_ch]
            vh = kv_ref[0, :, k0 + attn_ch:k0 + 2 * attn_ch]

            # weight[t, s] = sum_c q[t, c] * k[s, c] — contract the last dims of BOTH
            # operands (no K transpose), accumulate in f32 on the MXU.
            w = lax.dot_general(
                qh, kh,
                dimension_numbers=(((1,), (1,)), ((), ())),
                preferred_element_type=jnp.float32)         # (ctx_tile, n_data) f32

            # Softmax numerator in f32; normalization deferred until after P@V.
            w_max = jnp.max(w, axis=-1, keepdims=True)
            w_exp = jnp.exp(w - w_max)
            denom = jnp.sum(w_exp, axis=-1, keepdims=True)   # (ctx_tile, 1) f32

            # out_unnorm[t, c] = sum_s exp(w)[t, s] * v[s, c]   (f32 acc on MXU)
            o_un = jnp.dot(w_exp.astype(vh.dtype), vh,
                           preferred_element_type=jnp.float32)   # (ctx_tile, attn_ch)
            o_h = o_un * pl.reciprocal(denom, approx=True)
            outs.append(o_h)

        # One lane-dense, full-width store per ctx tile.
        o_full = outs[0] if len(outs) == 1 else jnp.concatenate(outs, axis=-1)
        o_ref[0, :, :] = o_full.astype(o_ref.dtype)

    return attn_kernel


def _pick_ctx_tile(n_ctx: int) -> int:
    if n_ctx <= 512:
        return n_ctx           # full dim -> always layout-legal
    for t in (512, 256, 128):  # multiples of 8 -> layout-legal tiles
        if n_ctx % t == 0:
            return t
    return n_ctx


def qkv_multihead_cross_attention(q, kv, *, heads: int, head_blocks=None,
                                  ctx_tile=None):
    """Pallas implementation of QKVMultiheadCrossAttention.forward.

    q : (bs, n_ctx, heads * attn_ch)
    kv: (bs, n_data, heads * 2 * attn_ch)
    returns: (bs, n_ctx, heads * attn_ch)
    """
    bs, n_ctx, q_width = q.shape
    kv_bs, n_data, kv_width = kv.shape
    assert kv_bs == bs
    attn_ch = kv_width // heads // 2
    assert q_width == heads * attn_ch, "q width must equal heads * attn_ch"
    assert kv_width == heads * 2 * attn_ch
    scale = 1.0 / math.sqrt(math.sqrt(attn_ch))

    if head_blocks is None:
        head_blocks = 1
        # Split heads across grid blocks (keeps both v7x TensorCores busy at small
        # bs and shrinks the resident kv tile) only when per-block last-dim widths
        # stay 128-lane aligned.
        if heads % 2 == 0 and ((heads // 2) * attn_ch) % 128 == 0:
            head_blocks = 2
    assert heads % head_blocks == 0
    heads_per_block = heads // head_blocks

    if ctx_tile is None:
        ctx_tile = _pick_ctx_tile(n_ctx)
    assert n_ctx % ctx_tile == 0
    ctx_blocks = n_ctx // ctx_tile

    q_blk = heads_per_block * attn_ch
    kv_blk = heads_per_block * 2 * attn_ch

    kernel = _make_attn_kernel(heads_per_block, attn_ch, scale)

    itemsize = jnp.dtype(q.dtype).itemsize
    # VMEM budget: double-buffered q/kv/out tiles + f32 softmax working set of the
    # currently-live head (w + w_exp), plus slack.
    io_bytes = 2 * (ctx_tile * q_blk + n_data * kv_blk + ctx_tile * q_blk) * itemsize
    work_bytes = 2 * ctx_tile * n_data * 4
    vmem_limit = int(min(100 * 1024 * 1024,
                         max(32 * 1024 * 1024,
                             io_bytes + work_bytes + (4 << 20))))

    out_elems = bs * n_ctx * heads * attn_ch
    cost = pl.CostEstimate(
        flops=4 * bs * heads * n_ctx * n_data * attn_ch,
        transcendentals=bs * heads * n_ctx * n_data,
        bytes_accessed=(bs * n_ctx * q_width + bs * n_data * kv_width + out_elems)
        * itemsize)

    out = pl.pallas_call(
        kernel,
        out_shape=jax.ShapeDtypeStruct((bs, n_ctx, heads * attn_ch), q.dtype),
        grid_spec=pltpu.PrefetchScalarGridSpec(
            num_scalar_prefetch=0,
            # ctx axis innermost: kv block index is constant across it -> no re-DMA.
            grid=(bs, head_blocks, ctx_blocks),
            in_specs=[
                pl.BlockSpec((1, ctx_tile, q_blk), lambda b, g, t: (b, t, g)),
                pl.BlockSpec((1, n_data, kv_blk), lambda b, g, t: (b, 0, g)),
            ],
            out_specs=pl.BlockSpec((1, ctx_tile, q_blk), lambda b, g, t: (b, t, g)),
        ),
        compiler_params=pltpu.CompilerParams(
            dimension_semantics=("parallel", "parallel", "arbitrary"),
            vmem_limit_bytes=vmem_limit),
        cost_estimate=cost,
    )(q, kv)
    return out


def _reference(q, kv, *, heads: int):
    """Pure-JAX reference mirroring the PyTorch forward exactly."""
    bs, n_ctx, _ = q.shape
    _, n_data, width = kv.shape
    attn_ch = width // heads // 2
    scale = 1.0 / math.sqrt(math.sqrt(attn_ch))
    qh = q.reshape(bs, n_ctx, heads, -1)
    kvh = kv.reshape(bs, n_data, heads, -1)
    k, v = kvh[..., :attn_ch], kvh[..., attn_ch:]
    weight = jnp.einsum("bthc,bshc->bhts", qh * scale, k * scale)
    weight = jax.nn.softmax(weight.astype(jnp.float32), axis=-1).astype(weight.dtype)
    return jnp.einsum("bhts,bshc->bthc", weight, v).reshape(bs, n_ctx, -1)


if __name__ == "__main__":
    # Small shapes consistent with the module:
    #   heads=4, attn_ch=8  ->  q width = 32, kv width = 64
    bs, n_ctx, n_data, heads, attn_ch = 2, 16, 8, 4, 8
    key = jax.random.PRNGKey(0)
    kq, kkv = jax.random.split(key)
    q = jax.random.normal(kq, (bs, n_ctx, heads * attn_ch), dtype=jnp.float32)
    kv = jax.random.normal(kkv, (bs, n_data, heads * 2 * attn_ch), dtype=jnp.float32)

    out = qkv_multihead_cross_attention(q, kv, heads=heads)
    out = jax.block_until_ready(out)

    ref = _reference(q, kv, heads=heads)
    assert out.shape == (bs, n_ctx, heads * attn_ch)
    # Tolerance is slightly loosened vs bit-exact torch ordering: approx EUP
    # reciprocal + post-P@V normalization are rounding-level deviations.
    assert jnp.allclose(out, ref, atol=2e-3, rtol=2e-3), float(
        jnp.max(jnp.abs(out - ref)))

    print("KERNEL_OK")
</pallas_src>

<mosaic_0001>
module attributes {stable_mosaic.version = 11 : i64} {
  func.func @attn_kernel(%arg0: i32, %arg1: i32, %arg2: i32, %arg3: memref<1x16x32xf32, #tpu.memory_space<vmem>>, %arg4: memref<1x8x64xf32, #tpu.memory_space<vmem>>, %arg5: memref<1x16x32xf32, #tpu.memory_space<vmem>>) attributes {dimension_semantics = [#tpu.dimension_semantics<parallel>, #tpu.dimension_semantics<parallel>, #tpu.dimension_semantics<arbitrary>], iteration_bounds = array<i64: 2, 1, 1>, scalar_prefetch = 0 : i64, scratch_operands = 0 : i64, tpu.core_type = #tpu.core_type<tc>, window_params = [{transform_indices = @transform_0, window_bounds = array<i64: 1, 16, 32>}, {transform_indices = @transform_1, window_bounds = array<i64: 1, 8, 64>}, {transform_indices = @transform_2, window_bounds = array<i64: 1, 16, 32>}]} {
    %c0 = arith.constant 0 : index
    %c0_0 = arith.constant 0 : index
    %c0_1 = arith.constant 0 : index
    %0 = vector.load %arg3[%c0, %c0_0, %c0_1] : memref<1x16x32xf32, #tpu.memory_space<vmem>>, vector<1x16x8xf32>
    %1 = vector.shape_cast %0 : vector<1x16x8xf32> to vector<16x8xf32>
    %cst = arith.constant 0.353553385 : f32
    %2 = vector.broadcast %cst : f32 to vector<16x8xf32>
    %3 = arith.mulf %1, %2 : vector<16x8xf32>
    %c0_2 = arith.constant 0 : index
    %c0_3 = arith.constant 0 : index
    %c0_4 = arith.constant 0 : index
    %4 = vector.load %arg4[%c0_2, %c0_3, %c0_4] : memref<1x8x64xf32, #tpu.memory_space<vmem>>, vector<1x8x8xf32>
    %5 = vector.shape_cast %4 : vector<1x8x8xf32> to vector<8x8xf32>
    %c0_5 = arith.constant 0 : index
    %c0_6 = arith.constant 0 : index
    %c8 = arith.constant 8 : index
    %6 = vector.load %arg4[%c0_5, %c0_6, %c8] : memref<1x8x64xf32, #tpu.memory_space<vmem>>, vector<1x8x8xf32>
    %7 = vector.shape_cast %6 : vector<1x8x8xf32> to vector<8x8xf32>
    %cst_7 = arith.constant dense<0.000000e+00> : vector<16x8xf32>
    %8 = tpu.matmul %3, %5, %cst_7 {dimension_numbers = #tpu.dot_dimension_numbers<[1], [1], [0], [0], [0, 0, 1, 0], [], []>} : vector<16x8xf32>, vector<8x8xf32>, vector<16x8xf32> -> vector<16x8xf32>
    %cst_8 = arith.constant dense<0xFF800000> : vector<16xf32>
    %9 = vector.multi_reduction <maximumf>, %8, %cst_8 [1] : vector<16x8xf32> to vector<16xf32>
    %10 = vector.shape_cast %9 : vector<16xf32> to vector<16x1xf32>
    %11 = vector.broadcast %10 : vector<16x1xf32> to vector<16x8xf32>
    %12 = arith.subf %8, %11 : vector<16x8xf32>
    %13 = math.exp %12 : vector<16x8xf32>
    %cst_9 = arith.constant dense<0.000000e+00> : vector<16xf32>
    %14 = vector.multi_reduction <add>, %13, %cst_9 [1] : vector<16x8xf32> to vector<16xf32>
    %15 = vector.shape_cast %14 : vector<16xf32> to vector<16x1xf32>
    %cst_10 = arith.constant dense<0.000000e+00> : vector<16x8xf32>
    %16 = tpu.matmul %13, %7, %cst_10 {dimension_numbers = #tpu.dot_dimension_numbers<[1], [0], [0], [1], [0, 0, 1, 1], [], []>} : vector<16x8xf32>, vector<8x8xf32>, vector<16x8xf32> -> vector<16x8xf32>
    %17 = tpu.reciprocal %15 {approx = true} : vector<16x1xf32> -> vector<16x1xf32>
    %18 = vector.broadcast %17 : vector<16x1xf32> to vector<16x8xf32>
    %19 = arith.mulf %16, %18 : vector<16x8xf32>
    %c0_11 = arith.constant 0 : index
    %c0_12 = arith.constant 0 : index
    %c8_13 = arith.constant 8 : index
    %20 = vector.load %arg3[%c0_11, %c0_12, %c8_13] : memref<1x16x32xf32, #tpu.memory_space<vmem>>, vector<1x16x8xf32>
    %21 = vector.shape_cast %20 : vector<1x16x8xf32> to vector<16x8xf32>
    %cst_14 = arith.constant 0.353553385 : f32
    %22 = vector.broadcast %cst_14 : f32 to vector<16x8xf32>
    %23 = arith.mulf %21, %22 : vector<16x8xf32>
    %c0_15 = arith.constant 0 : index
    %c0_16 = arith.constant 0 : index
    %c16 = arith.constant 16 : index
    %24 = vector.load %arg4[%c0_15, %c0_16, %c16] : memref<1x8x64xf32, #tpu.memory_space<vmem>>, vector<1x8x8xf32>
    %25 = vector.shape_cast %24 : vector<1x8x8xf32> to vector<8x8xf32>
    %c0_17 = arith.constant 0 : index
    %c0_18 = arith.constant 0 : index
    %c24 = arith.constant 24 : index
    %26 = vector.load %arg4[%c0_17, %c0_18, %c24] : memref<1x8x64xf32, #tpu.memory_space<vmem>>, vector<1x8x8xf32>
    %27 = vector.shape_cast %26 : vector<1x8x8xf32> to vector<8x8xf32>
    %cst_19 = arith.constant dense<0.000000e+00> : vector<16x8xf32>
    %28 = tpu.matmul %23, %25, %cst_19 {dimension_numbers = #tpu.dot_dimension_numbers<[1], [1], [0], [0], [0, 0, 1, 0], [], []>} : vector<16x8xf32>, vector<8x8xf32>, vector<16x8xf32> -> vector<16x8xf32>
    %cst_20 = arith.constant dense<0xFF800000> : vector<16xf32>
    %29 = vector.multi_reduction <maximumf>, %28, %cst_20 [1] : vector<16x8xf32> to vector<16xf32>
    %30 = vector.shape_cast %29 : vector<16xf32> to vector<16x1xf32>
    %31 = vector.broadcast %30 : vector<16x1xf32> to vector<16x8xf32>
    %32 = arith.subf %28, %31 : vector<16x8xf32>
    %33 = math.exp %32 : vector<16x8xf32>
    %cst_21 = arith.constant dense<0.000000e+00> : vector<16xf32>
    %34 = vector.multi_reduction <add>, %33, %cst_21 [1] : vector<16x8xf32> to vector<16xf32>
    %35 = vector.shape_cast %34 : vector<16xf32> to vector<16x1xf32>
    %cst_22 = arith.constant dense<0.000000e+00> : vector<16x8xf32>
    %36 = tpu.matmul %33, %27, %cst_22 {dimension_numbers = #tpu.dot_dimension_numbers<[1], [0], [0], [1], [0, 0, 1, 1], [], []>} : vector<16x8xf32>, vector<8x8xf32>, vector<16x8xf32> -> vector<16x8xf32>
    %37 = tpu.reciprocal %35 {approx = true} : vector<16x1xf32> -> vector<16x1xf32>
    %38 = vector.broadcast %37 : vector<16x1xf32> to vector<16x8xf32>
    %39 = arith.mulf %36, %38 : vector<16x8xf32>
    %c0_23 = arith.constant 0 : index
    %c0_24 = arith.constant 0 : index
    %c16_25 = arith.constant 16 : index
    %40 = vector.load %arg3[%c0_23, %c0_24, %c16_25] : memref<1x16x32xf32, #tpu.memory_space<vmem>>, vector<1x16x8xf32>
    %41 = vector.shape_cast %40 : vector<1x16x8xf32> to vector<16x8xf32>
    %cst_26 = arith.constant 0.353553385 : f32
    %42 = vector.broadcast %cst_26 : f32 to vector<16x8xf32>
    %43 = arith.mulf %41, %42 : vector<16x8xf32>
    %c0_27 = arith.constant 0 : index
    %c0_28 = arith.constant 0 : index
    %c32 = arith.constant 32 : index
    %44 = vector.load %arg4[%c0_27, %c0_28, %c32] : memref<1x8x64xf32, #tpu.memory_space<vmem>>, vector<1x8x8xf32>
    %45 = vector.shape_cast %44 : vector<1x8x8xf32> to vector<8x8xf32>
    %c0_29 = arith.constant 0 : index
    %c0_30 = arith.constant 0 : index
    %c40 = arith.constant 40 : index
    %46 = vector.load %arg4[%c0_29, %c0_30, %c40] : memref<1x8x64xf32, #tpu.memory_space<vmem>>, vector<1x8x8xf32>
    %47 = vector.shape_cast %46 : vector<1x8x8xf32> to vector<8x8xf32>
    %cst_31 = arith.constant dense<0.000000e+00> : vector<16x8xf32>
    %48 = tpu.matmul %43, %45, %cst_31 {dimension_numbers = #tpu.dot_dimension_numbers<[1], [1], [0], [0], [0, 0, 1, 0], [], []>} : vector<16x8xf32>, vector<8x8xf32>, vector<16x8xf32> -> vector<16x8xf32>
    %cst_32 = arith.constant dense<0xFF800000> : vector<16xf32>
    %49 = vector.multi_reduction <maximumf>, %48, %cst_32 [1] : vector<16x8xf32> to vector<16xf32>
    %50 = vector.shape_cast %49 : vector<16xf32> to vector<16x1xf32>
    %51 = vector.broadcast %50 : vector<16x1xf32> to vector<16x8xf32>
    %52 = arith.subf %48, %51 : vector<16x8xf32>
    %53 = math.exp %52 : vector<16x8xf32>
    %cst_33 = arith.constant dense<0.000000e+00> : vector<16xf32>
    %54 = vector.multi_reduction <add>, %53, %cst_33 [1] : vector<16x8xf32> to vector<16xf32>
    %55 = vector.shape_cast %54 : vector<16xf32> to vector<16x1xf32>
    %cst_34 = arith.constant dense<0.000000e+00> : vector<16x8xf32>
    %56 = tpu.matmul %53, %47, %cst_34 {dimension_numbers = #tpu.dot_dimension_numbers<[1], [0], [0], [1], [0, 0, 1, 1], [], []>} : vector<16x8xf32>, vector<8x8xf32>, vector<16x8xf32> -> vector<16x8xf32>
    %57 = tpu.reciprocal %55 {approx = true} : vector<16x1xf32> -> vector<16x1xf32>
    %58 = vector.broadcast %57 : vector<16x1xf32> to vector<16x8xf32>
    %59 = arith.mulf %56, %58 : vector<16x8xf32>
    %c0_35 = arith.constant 0 : index
    %c0_36 = arith.constant 0 : index
    %c24_37 = arith.constant 24 : index
    %60 = vector.load %arg3[%c0_35, %c0_36, %c24_37] : memref<1x16x32xf32, #tpu.memory_space<vmem>>, vector<1x16x8xf32>
    %61 = vector.shape_cast %60 : vector<1x16x8xf32> to vector<16x8xf32>
    %cst_38 = arith.constant 0.353553385 : f32
    %62 = vector.broadcast %cst_38 : f32 to vector<16x8xf32>
    %63 = arith.mulf %61, %62 : vector<16x8xf32>
    %c0_39 = arith.constant 0 : index
    %c0_40 = arith.constant 0 : index
    %c48 = arith.constant 48 : index
    %64 = vector.load %arg4[%c0_39, %c0_40, %c48] : memref<1x8x64xf32, #tpu.memory_space<vmem>>, vector<1x8x8xf32>
    %65 = vector.shape_cast %64 : vector<1x8x8xf32> to vector<8x8xf32>
    %c0_41 = arith.constant 0 : index
    %c0_42 = arith.constant 0 : index
    %c56 = arith.constant 56 : index
    %66 = vector.load %arg4[%c0_41, %c0_42, %c56] : memref<1x8x64xf32, #tpu.memory_space<vmem>>, vector<1x8x8xf32>
    %67 = vector.shape_cast %66 : vector<1x8x8xf32> to vector<8x8xf32>
    %cst_43 = arith.constant dense<0.000000e+00> : vector<16x8xf32>
    %68 = tpu.matmul %63, %65, %cst_43 {dimension_numbers = #tpu.dot_dimension_numbers<[1], [1], [0], [0], [0, 0, 1, 0], [], []>} : vector<16x8xf32>, vector<8x8xf32>, vector<16x8xf32> -> vector<16x8xf32>
    %cst_44 = arith.constant dense<0xFF800000> : vector<16xf32>
    %69 = vector.multi_reduction <maximumf>, %68, %cst_44 [1] : vector<16x8xf32> to vector<16xf32>
    %70 = vector.shape_cast %69 : vector<16xf32> to vector<16x1xf32>
    %71 = vector.broadcast %70 : vector<16x1xf32> to vector<16x8xf32>
    %72 = arith.subf %68, %71 : vector<16x8xf32>
    %73 = math.exp %72 : vector<16x8xf32>
    %cst_45 = arith.constant dense<0.000000e+00> : vector<16xf32>
    %74 = vector.multi_reduction <add>, %73, %cst_45 [1] : vector<16x8xf32> to vector<16xf32>
    %75 = vector.shape_cast %74 : vector<16xf32> to vector<16x1xf32>
    %cst_46 = arith.constant dense<0.000000e+00> : vector<16x8xf32>
    %76 = tpu.matmul %73, %67, %cst_46 {dimension_numbers = #tpu.dot_dimension_numbers<[1], [0], [0], [1], [0, 0, 1, 1], [], []>} : vector<16x8xf32>, vector<8x8xf32>, vector<16x8xf32> -> vector<16x8xf32>
    %77 = tpu.reciprocal %75 {approx = true} : vector<16x1xf32> -> vector<16x1xf32>
    %78 = vector.broadcast %77 : vector<16x1xf32> to vector<16x8xf32>
    %79 = arith.mulf %76, %78 : vector<16x8xf32>
    %80 = tpu.concatenate %19, %39, %59, %79 in 1 : vector<16x8xf32>, vector<16x8xf32>, vector<16x8xf32>, vector<16x8xf32> -> vector<16x32xf32>
    %c0_47 = arith.constant 0 : index
    %c0_48 = arith.constant 0 : index
    %c0_49 = arith.constant 0 : index
    %81 = vector.load %arg5[%c0_47, %c0_48, %c0_49] : memref<1x16x32xf32, #tpu.memory_space<vmem>>, vector<1x16x32xf32>
    %82 = vector.shape_cast %81 : vector<1x16x32xf32> to vector<16x32xf32>
    %83 = vector.shape_cast %80 : vector<16x32xf32> to vector<1x16x32xf32>
    tpu.vector_store %arg5[%c0_47, %c0_48, %c0_49], %83 {strides = array<i32>} : memref<1x16x32xf32, #tpu.memory_space<vmem>>, vector<1x16x32xf32>,
    return
  }
  func.func @transform_0(%arg0: i32, %arg1: i32, %arg2: i32) -> (i32, i32, i32) {
    %c0_i32 = arith.constant 0 : i32
    return %arg0, %arg2, %arg1 : i32, i32, i32
  }
  func.func @transform_1(%arg0: i32, %arg1: i32, %arg2: i32) -> (i32, i32, i32) {
    %c0_i32 = arith.constant 0 : i32
    %c0_i32_0 = arith.constant 0 : i32
    return %arg0, %c0_i32, %arg1 : i32, i32, i32
  }
  func.func @transform_2(%arg0: i32, %arg1: i32, %arg2: i32) -> (i32, i32, i32) {
    %c0_i32 = arith.constant 0 : i32
    return %arg0, %arg2, %arg1 : i32, i32, i32
  }
}

</mosaic_0001>

<bundles_post_ra>
// kernel: tpu_custom_call.1
= control target key start
LH: loop header
LB: loop body
LE: loop exit
PB: predicated region body
PF: predicated region fallthrough
CT: control target
= control target key end

     0   :  { %7 = vsyncpa [#allocation3], 0  ;;  %s1821_s0 = inlined_call_operand.hbm [shape: f32[2,16,32], index: 0, kind: input, shape index: {}]   ;;  %s1822_s1 = inlined_call_operand.hbm [shape: f32[2,8,64], index: 1, kind: input, shape index: {}]   ;;  %s1823_s2 = inlined_call_operand.hbm [shape: f32[2,16,32], index: 2, kind: output, shape index: {}]  }
   0x1   :  { %9 = vsyncpa [#allocation3 + $0x1], 0 }
   0x2   :  { %10 = vsyncpa [#allocation6], 0 }
   0x3   :  { %12 = vsyncpa [#allocation6 + $0x1], 0 }
   0x4   :  { %13 = vsyncpa [#allocation4], 0 }
   0x5   :  { %15 = vsyncpa [#allocation4 + $0x1], 0  ;;  %s1566_s9 = smov 0   ;;  %s1568_s10 = smov 0  }
   0x6   :  { %s1570_s11 = smov 0   ;;  %s1572_s12 = smov 0  }
   0x7   :  { %s1574_s13 = smov 0   ;;  %s1576_s14 = smov 0  }
   0x8 LB: > { %s1177_s15 = sadd.s32 4294967295, %s1533_s14   ;;  %s1178_s16 = sadd.s32 4294967294, %s1533_s14   ;;  %s1533_s14 = sphi %s1576_s14, %s21_s14   ;;  %s1529_s13 = sphi %s1574_s13, %s1834_s13   ;;  %s1525_s12 = sphi %s1572_s12, %s1833_s12   ;;  %s1521_s11 = sphi %s1570_s11, %s1832_s11   ;;  %s1517_s10 = sphi %s1568_s10, %s1831_s10   ;;  %s1513_s9 = sphi %s1566_s9, %s1830_s9  }
   0x9   : > { %s40_s17 = sadd.s32 1, %s1529_s13  ;;  %s51_s18 = sadd.s32 1, %s1521_s11 }
   0xa   : > { %p42_p0 = scmp.ge.s32.totalorder %s40_s17, 2  ;;  %p58_p1 = scmp.ne.s32.totalorder %s1521_s11, %s1517_s10 }
   0xb   : > { %p59_p2 = scmp.eq.s32.totalorder %s1533_s14, 0  ;;  %p64_p3 = scmp.ne.s32.totalorder %s1517_s10, %s1513_s9 }
   0xc   : > { %s1836_s17 = smov (%p42_p0, %s40_s17), 0  ;;  %p65_p5 = scmp.eq.s32.totalorder %s1177_s15, 0 }
   0xd   : > { %p1607_p4 = por %p59_p2, %p58_p1  ;;  %s44_s20 = ssub.s32 %s1529_s13, %s1836_s17 }
   0xe   : > { %p120_p6 = scmp.eq.s32.totalorder %s1177_s15, 1  ;;  %p49_p7 = scmp.eq.s32.totalorder %s44_s20, 0 }
   0xf   : > { %p1613_p8 = por %p65_p5, %p64_p3  ;;  %p126_p10 = scmp.eq.s32.totalorder %s1178_s16, 1 }
  0x10   : > { %p1617_p9 = por %p120_p6, %p58_p1  ;;  %p1180_p12 = scmp.ge.s32.totalorder %s1533_s14, 2 }
  0x11   : > { %s1622_s23 = scalar_select %p49_p7, %s1521_s11, %s51_s18  }
  0x12   : > { %p1624_p11 = por %p126_p10, %p64_p3  ;;  %p1298_p13 = scmp.lt.s32.totalorder %s1533_s14, 2 }
  0x13   : > { %s1631_s25 = sand.u32 1, %s1521_s11   ;;  %s1215_s27 = sshll.u32 %s1529_s13, 8 }
  0x14   : > { %s1181_s26 = sshll.u32 %s1631_s25, 4  ;;  %s159_s30 = scalar_lea.hbm %s1821_s0, %s1215_s27 }
  0x15   : > { %s150_s3 = scalar_lea.vmem [#allocation2], %s1181_s26  ;;  %p1640_p0 = pnand %p1298_p13, %p1607_p4 }
  0x16   : > { %s160_s4 = sshll.u32 %s150_s3, 4  ;;  %p1186_p1 = scmp.ge.s32.totalorder %s1533_s14, 1  ;;  %s161_s4 = int_to_ptr.vmem [resolvable:$true] %s160_s4 }
  0x17   : > { %s147_s6 = scalar_lea.sflag [#allocation3], %s1631_s25  ;;  %p1395_p2 = pneg %p1640_p0 }
  0x18   : > { %s1406_s7 = scalar_lea.vmem %s161_s4, 256  ;;  %s1535_s8 = smov [#allocation2]  }
  0x19   : > { %p1407_p3 = scmp.ne.s32.totalorder %s161_s4, %s1406_s7  ;;  %s1411_s15 = sshll.u32 %s1535_s8, 4  ;;  %s1412_s15 = int_to_ptr.vmem [resolvable:$false] %s1411_s15 }
  0x1a   : > { %s1413_s16 = scalar_lea.vmem %s1412_s15, 512  ;;  %p1414_p4 = scmp.lt.s32.totalorder %s161_s4, %s1412_s15 }
  0x1b   : > { %p1409_p5 = pnand %p1407_p3, %p1395_p2  ;;  %p1415_p7 = scmp.lt.s32.totalorder %s1413_s16, %s1406_s7 }
  0x1d   : > { %p1410_p6 = pneg %p1409_p5  ;;  %p1416_p10 = por %p1415_p7, %p1414_p4 }
  0x1f   : > { %p1417_p13 = pnand %p1416_p10, %p1410_p6 }
  0x21   : > { %1420 = shalt.err (!%p1417_p13)
}
  0x22   : > { %s1536_s18 = smov 128   ;;  %s1537_s19 = smov 8  }
  0x23   : > { %1290 = dma.hbm_to_vmem [thread:$0]  (!%p1640_p0), %s159_s30, 256, %s161_s4, %s147_s6, %s1536_s18, %s1536_s18, %s1537_s19  }
  0x24   : > { %p187_p3 = scmp.lt.s32.totalorder %s1533_s14, 3  ;;  %s1184_s20 = sshll.u32 %s1631_s25, 3 }
  0x25   : > { %s1185_s26 = sshll.u32 %s1529_s13, 7  ;;  %s174_s7 = scalar_lea.vmem [#allocation5], %s1184_s20 }
  0x26   : > { %p1658_p5 = pnand %p1186_p1, %p187_p3  ;;  %s180_s3 = scalar_lea.hbm %s1822_s1, %s1185_s26 }
  0x27   : > { %s182_s8 = sshll.u32 %s174_s7, 4  ;;  %s171_s15 = scalar_lea.sflag [#allocation6], %s1631_s25  ;;  %s183_s8 = int_to_ptr.vmem [resolvable:$true] %s182_s8 }
  0x28   : > { %s1434_s16 = scalar_lea.vmem %s183_s8, 128  ;;  %s1538_s30 = smov [#allocation5]  }
  0x29   : > { %p1435_p6 = scmp.ne.s32.totalorder %s183_s8, %s1434_s16  ;;  %s1439_s4 = sshll.u32 %s1538_s30, 4  ;;  %s1440_s4 = int_to_ptr.vmem [resolvable:$false] %s1439_s4 }
  0x2a   : > { %s1441_s6 = scalar_lea.vmem %s1440_s4, 256  ;;  %p1442_p1 = scmp.lt.s32.totalorder %s183_s8, %s1440_s4 }
  0x2b   : > { %p1437_p4 = pnand %p1435_p6, %p1395_p2  ;;  %p1443_p10 = scmp.lt.s32.totalorder %s1441_s6, %s1434_s16 }
  0x2d   : > { %p1438_p7 = pneg %p1437_p4  ;;  %p1444_p13 = por %p1443_p10, %p1442_p1 }
  0x2f   : > { %p1445_p3 = pnand %p1444_p13, %p1438_p7 }
  0x31   : > { %1448 = shalt.err (!%p1445_p3)
}
  0x32   : > { %1293 = dma.hbm_to_vmem [thread:$0]  (!%p1640_p0), %s180_s3, 128, %s183_s8, %s171_s15  }
  0x33   : > { %191 = sbr.rel (%p1658_p5) target bundleno = 1117 (0x45d), region = 28  ;;  %s1674_s25 = sand.u32 (!%p1658_p5), 1, %s1517_s10  }
  0x34   : > { %s1187_s18 = sshll.u32 (!%p1658_p5), %s1674_s25, 4  ;;  %s194_s19 = scalar_lea.sflag (!%p1658_p5), [#allocation3], %s1674_s25 }
  0x35   : > { %s197_s20 = scalar_lea.vmem (!%p1658_p5), [#allocation2], %s1187_s18 }
  0x38   : > { %1500 = dma.done.wait (%p1613_p8), %s194_s19, 256  }
  0x39   : > { %1502 = vsyncadd (%p1613_p8), %s194_s19, 4294967040  ;;  %s1188_s5 = sshll.u32 %s1674_s25, 3  ;;  %s203_s26 = scalar_lea.sflag [#allocation6], %s1674_s25 }
  0x3a   : > { %s206_s27 = scalar_lea.vmem [#allocation5], %s1188_s5 }
  0x3b   : > { %1504 = dma.done.wait (%p1613_p8), %s203_s26, 128  }
  0x3c   : > { %1506 = vsyncadd (%p1613_p8), %s203_s26, 4294967168  ;;  %vm239_vm0 = vcmask 64512   ;;  %v1690_v0 = vld [vmem:[%s206_s27] sm:$0xff]  ;;  %v235_v2 = vld [vmem:[%s197_s20 + $0x8] sm:$0xff]  ;;  %s1539_s28 = smov 120   ;;  %s1540_s21 = smov 112  }
  0x3d   : > { %v234_v1 = vld [vmem:[%s197_s20] sm:$0xff]  ;;  %1241 = vmatprep.subr.msk.mxu0 %vm239_vm0, %v1690_v0  ;;  %v237_v4 = vmul.f32 0.35355338, %v235_v2  ;;  %342 = vrot.lane.b32.xlu1 %v1690_v0, %s1539_s28  ;;  %s1541_s29 = smov 96   ;;  %s1542_s3 = smov 80   ;;  %vm1038_vm1 = vcmask 195584  }
  0x3e   : > { %v236_v3 = vmul.f32 0.35355338, %v234_v1  ;;  %1242 = vmatpush3.xpose.msk.msra.mxu0 %vm239_vm0, %v1690_v0  ;;  %s1543_s7 = smov 104   ;;  %s1544_s8 = smov 88   ;;  %vm1035_vm2 = vcmask 130048   ;;  %vm1041_vm3 = vcmask 261120  }
  0x3f   : > { %s1545_s15 = smov 72   ;;  %s1546_s16 = smov 8  }
  0x40   : > { %1243 = vmatprep.mubr.msk.f32.mxu0 %vm239_vm0, %v236_v3  ;;  %s1547_s30 = smov 16   ;;  %s1548_s4 = smov 24  }
  0x41   : > { %1244 = vmatmul.mubr.msk.f32.vlgmr.msra.gmra.mxu0 %vm239_vm0, %v237_v4  ;;  %434 = vrot.lane.b32.xlu1 %v1690_v0, %s1540_s21  ;;  %s231_s6 = scalar_lea.vmem [#allocation7], %s1187_s18  ;;  %s1216_s20 = sshll.u32 %s1525_s12, 8 }
  0x42   : > { %s1061_s19 = sshll.u32 %s231_s6, 4  ;;  %s1771_s26 = scalar_lea.hbm %s1823_s2, %s1216_s20  ;;  %s1766_s19 = int_to_ptr.vmem [resolvable:$true] %s1061_s19 }
  0x43   : > { %s1045_s12 = scalar_lea.sflag [#allocation4], %s1674_s25  ;;  %s1449_s27 = scalar_lea.vmem %s1766_s19, 256 }
  0x44   : > { %p1450_p8 = scmp.ne.s32.totalorder %s1766_s19, %s1449_s27 }
  0x45   : > { %432 = vrot.lane.b32.xlu1 %v237_v4, %s1539_s28 }
  0x46   : > { %p1451_p0 = pnand %p1450_p8, %p1617_p9 }
  0x48   : > { %p1452_p2 = pneg %p1451_p0 }
  0x49   : > { %627 = vrot.lane.b32.xlu1 %v1690_v0, %s1541_s29 }
  0x4d   : > { %623 = vrot.lane.b32.xlu1 %v236_v3, %s1540_s21 }
  0x51   : > { %625 = vrot.lane.b32.xlu1 %v237_v4, %s1540_s21 }
  0x55   : > { %820 = vrot.lane.b32.xlu1 %v1690_v0, %s1542_s3 }
  0x59   : > { %816 = vrot.lane.b32.xlu1 %v236_v3, %s1543_s7 }
  0xaf   : > { %v343_v9 = vpop.permute.xlu1 %342 }
  0xb0   : > { %1246 = vmatprep.subr.mxu1 %v343_v9 }
  0xb1   : > { %1247 = vmatpush3.msra.mxu1 %v343_v9 }
  0xb3   : > { %v435_v10 = vpop.permute.xlu1 %434 }
  0xb4   : > { %1251 = vmatprep.subr.msk.mxu1 %vm239_vm0, %v435_v10 }
  0xb7   : > { %v433_v11 = vpop.permute.xlu1 %432 }
  0xbb   : > { %v628_v17 = vpop.permute.xlu1 %627 }
  0xbf   : > { %v624_v19 = vpop.permute.xlu1 %623 }
  0xc3   : > { %v626_v20 = vpop.permute.xlu1 %625 }
  0xc7   : > { %v821_v24 = vpop.permute.xlu1 %820 }
  0xcb   : > { %v817_v25 = vpop.permute.xlu1 %816 }
 0x101   : > { %v1245_v5 = vpop.f32.mrf.mxu0 }
 0x102   : > { %v327_v8 = vsel %vm239_vm0, %v1245_v5, -inf }
 0x103   : > { %v315_v6 = vpop.f32.mrf.mxu0 }
 0x104   : > { %v324_v7 = vsel %vm239_vm0, %v315_v6, -inf }
 0x105   : > { %325 = vmax.xlane.f32.xlu0 %v324_v7 }
 0x109   : > { %328 = vmax.xlane.f32.xlu0 %v327_v8 }
 0x11f   : > { %430 = vrot.lane.b32.xlu0 %v236_v3, %s1539_s28  ;;  %s1549_s28 = smov [#allocation7]  }
 0x120   : > { %s1453_s21 = sshll.u32 %s1549_s28, 4  ;;  %s1454_s21 = int_to_ptr.vmem [resolvable:$false] %s1453_s21 }
 0x121   : > { %s1455_s29 = scalar_lea.vmem %s1454_s21, 512  ;;  %p1456_p5 = scmp.lt.s32.totalorder %s1766_s19, %s1454_s21 }
 0x122   : > { %p1457_p6 = scmp.lt.s32.totalorder %s1455_s29, %s1449_s27 }
 0x123   : > { %818 = vrot.lane.b32.xlu0 %v237_v4, %s1543_s7 }
 0x124   : > { %p1458_p4 = por %p1457_p6, %p1456_p5 }
 0x126   : > { %p1459_p7 = pnand %p1458_p4, %p1452_p2 }
 0x18e   : > { %v326_v12 = vpop.xlane.xlu0 %325 }
 0x18f   : > { %v330_v13 = vsub.f32 %v315_v6, %v326_v12 }
 0x191   : > { %v332_v14 = vmul.f32 1.442695, %v330_v13 }
 0x192   : > { %v329_v15 = vpop.xlane.xlu0 %328 }
 0x193   : > { %1361 = vpow2.f32 %v332_v14  ;;  %v331_v16 = vsub.f32 %v1245_v5, %v329_v15 }
 0x195   : > { %v334_v18 = vmul.f32 1.442695, %v331_v16 }
 0x196   : > { %v431_v22 = vpop.permute.xlu0 %430 }
 0x197   : > { %1363 = vpow2.f32 %v334_v18 }
 0x19a   : > { %v819_v26 = vpop.permute.xlu0 %818 }
 0x1a0   : > { %v1707_v21 = vpop.eup %1361 }
 0x1a1   : > { %1248 = vmatprep.mubr.msk.f32.mxu1 %vm239_vm0, %v1707_v21 }
 0x1a4   : > { %v1711_v23 = vpop.eup %1363 }
 0x1a5   : > { %1249 = vmatmul.mubr.msk.f32.vlgmr.msra.gmra.mxu1 %vm239_vm0, %v1711_v23 }
 0x1a6   : > { %1252 = vmatpush3.xpose.msk.msra.mxu1 %vm239_vm0, %v435_v10  ;;  %1253 = vmatprep.mubr.msk.f32.mxu1 %vm239_vm0, %v431_v22  ;;  %v336_v10 = vsel %vm239_vm0, %v1707_v21, 0.0 }
 0x1a7   : > { %1261 = vmatprep.subr.msk.mxu1 %vm239_vm0, %v628_v17 }
 0x1a9   : > { %1254 = vmatmul.mubr.msk.f32.vlgmr.msra.gmra.mxu1 %vm239_vm0, %v433_v11  ;;  %v339_v11 = vsel %vm239_vm0, %v1711_v23, 0.0 }
 0x1aa   : > { %1262 = vmatpush3.xpose.msk.msra.mxu1 %vm239_vm0, %v628_v17  ;;  %1263 = vmatprep.mubr.msk.f32.mxu1 %vm239_vm0, %v624_v19 }
 0x1ab   : > { %1271 = vmatprep.subr.msk.mxu1 %vm239_vm0, %v821_v24 }
 0x1ad   : > { %1264 = vmatmul.mubr.msk.f32.vlgmr.msra.gmra.mxu1 %vm239_vm0, %v626_v20 }
 0x1ae   : > { %1272 = vmatpush3.xpose.msk.msra.mxu1 %vm239_vm0, %v821_v24  ;;  %1273 = vmatprep.mubr.msk.f32.mxu1 %vm239_vm0, %v817_v25 }
 0x1b1   : > { %1274 = vmatmul.mubr.msk.f32.vlgmr.msra.gmra.mxu1 %vm239_vm0, %v819_v26 }
 0x265   : > { %v1726_v27 = vpop.f32.mrf.mxu1 }
 0x267   : > { %v1728_v28 = vpop.f32.mrf.mxu1 }
 0x269   : > { %v1255_v29 = vpop.f32.mrf.mxu1 }
 0x26a   : > { %v520_v30 = vsel %vm239_vm0, %v1255_v29, -inf }
 0x26b   : > { %521 = vmax.xlane.f32.xlu0 %v520_v30  ;;  %v508_v31 = vpop.f32.mrf.mxu1 }
 0x26c   : > { %v517_v32 = vsel %vm239_vm0, %v508_v31, -inf }
 0x26d   : > { %v1265_v33 = vpop.f32.mrf.mxu1  ;;  %518 = vmax.xlane.f32.xlu1 %v517_v32 }
 0x26e   : > { %v713_v36 = vsel %vm239_vm0, %v1265_v33, -inf }
 0x26f   : > { %v701_v34 = vpop.f32.mrf.mxu1 }
 0x270   : > { %v710_v35 = vsel %vm239_vm0, %v701_v34, -inf }
 0x271   : > { %711 = vmax.xlane.f32.xlu0 %v710_v35  ;;  %714 = vmax.xlane.f32.xlu1 %v713_v36  ;;  %v1275_v37 = vpop.f32.mrf.mxu1 }
 0x272   : > { %v906_v38 = vsel %vm239_vm0, %v1275_v37, -inf }
 0x273   : > { %v894_v39 = vpop.f32.mrf.mxu1 }
 0x274   : > { %v903_v40 = vsel %vm239_vm0, %v894_v39, -inf }
 0x275   : > { %907 = vmax.xlane.f32.xlu1 %v906_v38  ;;  %904 = vmax.xlane.f32.xlu0 %v903_v40 }
 0x286   : > { %728 = vrot.lane.b32.xlu1 %v1690_v0, %s1544_s8 }
 0x28a   : > { %921 = vrot.lane.b32.xlu1 %v1690_v0, %s1545_s15 }
 0x28b   : > { %535 = vrot.lane.b32.xlu0 %v1690_v0, %s1543_s7 }
 0x2f4   : > { %v522_v41 = vpop.xlane.xlu0 %521 }
 0x2f5   : > { %v524_v42 = vsub.f32 %v1255_v29, %v522_v41 }
 0x2f6   : > { %v519_v43 = vpop.xlane.xlu1 %518 }
 0x2f7   : > { %v527_v44 = vmul.f32 1.442695, %v524_v42  ;;  %v523_v45 = vsub.f32 %v508_v31, %v519_v43 }
 0x2f9   : > { %1365 = vpow2.f32 %v527_v44  ;;  %v525_v46 = vmul.f32 1.442695, %v523_v45 }
 0x2fa   : > { %v715_v47 = vpop.xlane.xlu1 %714  ;;  %v712_v48 = vpop.xlane.xlu0 %711 }
 0x2fb   : > { %1367 = vpow2.f32 %v525_v46  ;;  %v717_v49 = vsub.f32 %v1265_v33, %v715_v47  ;;  %v716_v50 = vsub.f32 %v701_v34, %v712_v48 }
 0x2fd   : > { %v720_v51 = vmul.f32 1.442695, %v717_v49  ;;  %v718_v52 = vmul.f32 1.442695, %v716_v50 }
 0x2fe   : > { %v908_v53 = vpop.xlane.xlu1 %907  ;;  %v905_v54 = vpop.xlane.xlu0 %904 }
 0x2ff   : > { %1369 = vpow2.f32 %v720_v51  ;;  %v910_v55 = vsub.f32 %v1275_v37, %v908_v53  ;;  %v909_v56 = vsub.f32 %v894_v39, %v905_v54 }
 0x300   : > { %1371 = vpow2.f32 %v718_v52 }
 0x301   : > { %v913_v57 = vmul.f32 1.442695, %v910_v55  ;;  %v911_v58 = vmul.f32 1.442695, %v909_v56 }
 0x302   : > { %v536_v59 = vpop.permute.xlu0 %535  ;;  %v729_v60 = vpop.permute.xlu1 %728 }
 0x303   : > { %1373 = vpow2.f32 %v913_v57  ;;  %1256 = vmatprep.subr.mxu0 %v536_v59 }
 0x304   : > { %1375 = vpow2.f32 %v911_v58  ;;  %1257 = vmatpush3.msra.mxu0 %v536_v59 }
 0x305   : > { %1266 = vmatprep.subr.mxu0 %v729_v60 }
 0x306   : > { %v1366_v61 = vpop.eup %1365  ;;  %v922_v1 = vpop.permute.xlu1 %921 }
 0x307   : > { %v532_v62 = vsel %vm239_vm0, %v1366_v61, 0.0 }
 0x308   : > { %v1368_v63 = vpop.eup %1367  ;;  %533 = vadd.xlane.f32.xlu1 %v532_v62 }
 0x309   : > { %1258 = vmatprep.mubr.msk.f32.mxu0 %vm239_vm0, %v1368_v63  ;;  %v529_v0 = vsel %vm239_vm0, %v1368_v63, 0.0 }
 0x30a   : > { %530 = vadd.xlane.f32.xlu0 %v529_v0  ;;  %1259 = vmatmul.mubr.msk.f32.vlgmr.msra.gmra.mxu0 %vm239_vm0, %v1366_v61 }
 0x30b   : > { %1267 = vmatpush3.msra.mxu0 %v729_v60 }
 0x30c   : > { %v1370_v2 = vpop.eup %1369  ;;  %1276 = vmatprep.subr.mxu0 %v922_v1 }
 0x30d   : > { %v1372_v3 = vpop.eup %1371  ;;  %v725_v4 = vsel %vm239_vm0, %v1370_v2, 0.0 }
 0x30e   : > { %1268 = vmatprep.mubr.msk.f32.mxu0 %vm239_vm0, %v1372_v3  ;;  %726 = vadd.xlane.f32.xlu0 %v725_v4  ;;  %v722_v7 = vsel %vm239_vm0, %v1372_v3, 0.0 }
 0x30f   : > { %1269 = vmatmul.mubr.msk.f32.vlgmr.msra.gmra.mxu0 %vm239_vm0, %v1370_v2 }
 0x310   : > { %v1374_v5 = vpop.eup %1373  ;;  %1277 = vmatpush3.msra.mxu0 %v922_v1 }
 0x311   : > { %v1376_v6 = vpop.eup %1375  ;;  %v918_v9 = vsel %vm239_vm0, %v1374_v5, 0.0 }
 0x312   : > { %1278 = vmatprep.mubr.msk.f32.mxu0 %vm239_vm0, %v1376_v6  ;;  %723 = vadd.xlane.f32.xlu0 %v722_v7  ;;  %v915_v8 = vsel %vm239_vm0, %v1376_v6, 0.0 }
 0x313   : > { %916 = vadd.xlane.f32.xlu1 %v915_v8  ;;  %1279 = vmatmul.mubr.msk.f32.vlgmr.msra.gmra.mxu0 %vm239_vm0, %v1374_v5 }
 0x316   : > { %919 = vadd.xlane.f32.xlu0 %v918_v9 }
 0x317   : > { %337 = vadd.xlane.f32.xlu1 %v336_v10 }
 0x31a   : > { %340 = vadd.xlane.f32.xlu0 %v339_v11 }
 0x391   : > { %v534_v13 = vpop.xlane.xlu1 %533 }
 0x392   : > { %1377 = vrcp.f32 %v534_v13 }
 0x393   : > { %v531_v12 = vpop.xlane.xlu0 %530 }
 0x394   : > { %1379 = vrcp.f32 %v531_v12 }
 0x397   : > { %v727_v14 = vpop.xlane.xlu0 %726 }
 0x398   : > { %1381 = vrcp.f32 %v727_v14 }
 0x39b   : > { %v724_v15 = vpop.xlane.xlu0 %723 }
 0x39c   : > { %v917_v16 = vpop.xlane.xlu1 %916  ;;  %1383 = vrcp.f32 %v724_v15 }
 0x39d   : > { %1385 = vrcp.f32 %v917_v16 }
 0x39f   : > { %v920_v17 = vpop.xlane.xlu0 %919  ;;  %v1378_v18 = vpop.eup %1377 }
 0x3a0   : > { %1387 = vrcp.f32 %v920_v17  ;;  %v338_v38 = vpop.xlane.xlu1 %337 }
 0x3a1   : > { %v1380_v21 = vpop.eup %1379  ;;  %1389 = vrcp.f32 %v338_v38 }
 0x3a3   : > { %v341_v39 = vpop.xlane.xlu0 %340 }
 0x3a4   : > { %1391 = vrcp.f32 %v341_v39 }
 0x3a5   : > { %v1382_v25 = vpop.eup %1381 }
 0x3a9   : > { %v1384_v31 = vpop.eup %1383 }
 0x3aa   : > { %v1386_v32 = vpop.eup %1385 }
 0x3ad   : > { %v1388_v36 = vpop.eup %1387 }
 0x3ae   : > { %v1390_v41 = vpop.eup %1389 }
 0x3af   : > { %v428_v45 = vmul.f32 %v1390_v41, %v1728_v28 }
 0x3b1   : > { %v1392_v44 = vpop.eup %1391 }
 0x3b2   : > { %v429_v48 = vmul.f32 %v1392_v44, %v1726_v27 }
 0x3ca   : > { %v1260_v19 = vpop.f32.mrf.mxu0 }
 0x3cb   : > { %v622_v20 = vmul.f32 %v1378_v18, %v1260_v19 }
 0x3cc   : > { %v610_v22 = vpop.f32.mrf.mxu0 }
 0x3cd   : > { %v621_v24 = vmul.f32 %v1380_v21, %v610_v22  ;;  %1013 = vrot.lane.b32.xlu0 %v622_v20, %s1546_s16 }
 0x3cf   : > { %v1270_v23 = vpop.f32.mrf.mxu0  ;;  %1011 = vrot.lane.b32.xlu1 %v621_v24, %s1546_s16 }
 0x3d0   : > { %v815_v26 = vmul.f32 %v1382_v25, %v1270_v23 }
 0x3d1   : > { %v803_v29 = vpop.f32.mrf.mxu0 }
 0x3d2   : > { %v814_v33 = vmul.f32 %v1384_v31, %v803_v29 }
 0x3d3   : > { %v1280_v30 = vpop.f32.mrf.mxu0  ;;  %1021 = vrot.lane.b32.xlu1 %v815_v26, %s1547_s30 }
 0x3d4   : > { %v1008_v37 = vmul.f32 %v1388_v36, %v1280_v30 }
 0x3d5   : > { %v996_v34 = vpop.f32.mrf.mxu0 }
 0x3d6   : > { %v1007_v35 = vmul.f32 %v1386_v32, %v996_v34 }
 0x3d7   : > { %1019 = vrot.lane.b32.xlu1 %v814_v33, %s1547_s30 }
 0x3d8   : > { %1027 = vrot.lane.b32.xlu0 %v1007_v35, %s1548_s4 }
 0x3db   : > { %1029 = vrot.lane.b32.xlu1 %v1008_v37, %s1548_s4 }
 0x43f   : > { %v1014_v43 = vpop.permute.xlu0 %1013 }
 0x440   : > { %v1034_v28 = vsel %vm239_vm0, %v429_v48, %v1014_v43 }
 0x441   : > { %v1012_v40 = vpop.permute.xlu1 %1011 }
 0x442   : > { %v1033_v46 = vsel %vm239_vm0, %v428_v45, %v1012_v40 }
 0x445   : > { %v1022_v42 = vpop.permute.xlu1 %1021 }
 0x446   : > { %v1037_v52 = vsel %vm1035_vm2, %v1034_v28, %v1022_v42 }
 0x449   : > { %v1020_v47 = vpop.permute.xlu1 %1019 }
 0x44a   : > { %v1036_v49 = vsel %vm1035_vm2, %v1033_v46, %v1020_v47  ;;  %v1028_v50 = vpop.permute.xlu0 %1027 }
 0x44b   : > { %v1039_v51 = vsel %vm1038_vm1, %v1036_v49, %v1028_v50 }
 0x44c   : > { %1042 = vst.msk [vmem:[%s231_s6] sm:$0xff] %vm1041_vm3, %v1039_v51 }
 0x44d   : > { %v1030_v53 = vpop.permute.xlu1 %1029 }
 0x44e   : > { %v1040_v27 = vsel %vm1038_vm1, %v1037_v52, %v1030_v53 }
 0x44f   : > { %1043 = vst.msk [vmem:[%s231_s6 + $0x8] sm:$0xff] %vm1041_vm3, %v1040_v27 }
 0x450   : > { %1462 = shalt.err (!%p1459_p7)
}
 0x451   : > { %s1463_s3 = scalar_lea.hbm %s1771_s26, 256  ;;  %s1467_s15 = scalar_lea.hbm %s1823_s2, 512 }
 0x452   : > { %p1464_p1 = scmp.ne.s32.totalorder %s1771_s26, %s1463_s3  ;;  %p1468_p3 = scmp.lt.s32.totalorder %s1771_s26, %s1823_s2 }
 0x453   : > { %p1469_p8 = scmp.lt.s32.totalorder %s1467_s15, %s1463_s3 }
 0x454   : > { %p1465_p10 = pnand %p1464_p1, %p1617_p9 }
 0x455   : > { %p1470_p0 = por %p1469_p8, %p1468_p3 }
 0x456   : > { %p1466_p13 = pneg %p1465_p10 }
 0x458   : > { %p1471_p2 = pnand %p1470_p0, %p1466_p13 }
 0x45a   : > { %1474 = shalt.err (!%p1471_p2)
}
 0x45b   : > { %s1550_s6 = smov 128  }
 0x45c   : > { %1285 = dma.vmem_to_hbm [thread:$0]  (%p1617_p9), %s1766_s19, 256, %s1771_s26, %s1045_s12, %s1550_s6, %s1550_s6, %s1546_s16  }
 0x45d PF: > { %s1076_s20 = sand.u32 1, %s1513_s9   ;;  %p1295_p5 = pnand %p1180_p12, %p1624_p11 }
 0x45e   : > { %s1077_s18 = scalar_lea.sflag [#allocation4], %s1076_s20 }
 0x45f   : > { %p1296_p6 = pneg %p1295_p5 }
 0x461   : > { %1508 = dma.done.wait (%p1296_p6), %s1077_s18, 256  }
 0x462   : > { %1510 = vsyncadd (%p1296_p6), %s1077_s18, 4294967040  ;;  %s21_s14 = sadd.s32 1, %s1533_s14   ;;  %s1830_s9 = smov %s1517_s10 }
 0x463   : > { %p18_p4 = scmp.ge.s32.totalorder %s21_s14, 4   ;;  %s1831_s10 = smov %s1521_s11 }
 0x464   : > { %s1832_s11 = smov %s1622_s23  ;;  %s1833_s12 = smov %s1529_s13 }
 0x465   : > { %s1834_s13 = smov %s1836_s17  ;;  %20 = sbr.rel (!%p18_p4) target bundleno = 8 (0x8), region = 86 }
 0x46a   :  { %1082 = vsyncpa [#allocation3], 1 }
 0x46b   :  { %1084 = vsyncpa [#allocation3 + $0x1], 1 }
 0x46c   :  { %1085 = vsyncpa [#allocation6], 1 }
 0x46d   :  { %1087 = vsyncpa [#allocation6 + $0x1], 1 }
 0x46e   :  { %1088 = vsyncpa [#allocation4], 1 }
 0x46f   :  { %1090 = vsyncpa [#allocation4 + $0x1], 1 }

</bundles_post_ra>
